<compile_context>
chip_gen: v7x
topology: tpu7x:2x2x1
jax: 0.10.0
libtpu: 0.0.40
codegen_flags: <defaults>
</compile_context>

<pallas_src>
import functools

import jax
import jax.numpy as jnp
from jax import lax
from jax.experimental import pallas as pl
from jax.experimental.pallas import tpu as pltpu

BN_EPS = 1e-5
NEG_SLOPE = 0.1
SUBLANE = 8

# ----- chip-aware VMEM budget (v7x: 64 MiB, v5e/v6e: 128 MiB) ----------------
try:
    _VMEM_CAP = int(pltpu.get_tpu_info().vmem_capacity_bytes)
except Exception:  # conservative fallback = v7x capacity
    _VMEM_CAP = 64 * 1024 * 1024
_VMEM_BUDGET = _VMEM_CAP // 2                      # footprint target for tiles
_VMEM_LIMIT = min((_VMEM_CAP * 3) // 4, 112 * 1024 * 1024)


def _round_up(x, m):
    return (x + m - 1) // m * m


def _vmem_footprint(tm, k, cout, itemsize):
    return (2 * tm * k * itemsize        # double-buffered patches tile
            + 2 * tm * cout * 4          # double-buffered y / out tile
            + 2 * k * cout * itemsize    # weights (resident, double-buffered)
            + 6 * 2 * cout * 4)          # stats + scale + shift blocks


# --------------------- phase 1 kernels: conv (+ partial BN stats) ------------
def _conv_stats_kernel(p_ref, w_ref, stat_ref):
    # Stats-only variant (recompute-y path): no (M, Cout) HBM write.
    y = jnp.dot(p_ref[...], w_ref[...], preferred_element_type=jnp.float32)
    s1 = jnp.sum(y, axis=0, keepdims=True)        # (1, Cout)
    s2 = jnp.sum(y * y, axis=0, keepdims=True)    # (1, Cout)
    stat_ref[...] = jnp.concatenate([s1, s2], axis=0)[None]


def _conv_y_stats_kernel(p_ref, w_ref, y_ref, stat_ref):
    # Materialize-y variant (small Cout): y row is cheaper than a patches row.
    y = jnp.dot(p_ref[...], w_ref[...], preferred_element_type=jnp.float32)
    y_ref[...] = y
    s1 = jnp.sum(y, axis=0, keepdims=True)
    s2 = jnp.sum(y * y, axis=0, keepdims=True)
    stat_ref[...] = jnp.concatenate([s1, s2], axis=0)[None]


# --------------------- phase 2 kernels: BN affine + LeakyReLU ----------------
def _affine_lrelu_kernel(y_ref, scale_ref, shift_ref, o_ref):
    z = y_ref[...] * scale_ref[...] + shift_ref[...]
    o_ref[...] = jnp.where(z >= 0, z, NEG_SLOPE * z).astype(o_ref.dtype)


def _conv_affine_lrelu_kernel(p_ref, w_ref, scale_ref, shift_ref, o_ref):
    y = jnp.dot(p_ref[...], w_ref[...], preferred_element_type=jnp.float32)
    z = y * scale_ref[...] + shift_ref[...]
    o_ref[...] = jnp.where(z >= 0, z, NEG_SLOPE * z).astype(o_ref.dtype)


@functools.partial(jax.jit, static_argnames=("tile_m",))
def downsample_forward(x_nchw, w_oihw, gamma, beta, *, tile_m=1024):
    """Forward pass of Downsample. Input/output are NCHW (PyTorch convention)."""
    N, Cin, H, W = x_nchw.shape
    Cout, _, KH, KW = w_oihw.shape
    stride, pad = 2, KH // 2
    Ho = (H + 2 * pad - KH) // stride + 1
    Wo = (W + 2 * pad - KW) // stride + 1
    M = N * Ho * Wo
    K = KH * KW * Cin

    # bf16 MXU operands at production K (halves the patches/weight streams);
    # f32 at tiny K where bf16 rounding is visible at 1e-3 tolerance.
    mxu_dtype = jnp.bfloat16 if K >= 256 else jnp.float32
    itemsize = jnp.dtype(mxu_dtype).itemsize

    # --- glue: NCHW -> NHWC, pad, im2col at the TRUE K (no lane padding) -----
    x = jnp.transpose(x_nchw, (0, 2, 3, 1)).astype(mxu_dtype)            # NHWC
    xp = jnp.pad(x, ((0, 0), (pad, pad), (pad, pad), (0, 0)))
    taps = [xp[:, ky:ky + stride * Ho:stride, kx:kx + stride * Wo:stride, :]
            for ky in range(KH) for kx in range(KW)]                     # 9 x (N,Ho,Wo,Cin)
    patches = jnp.stack(taps, axis=3).reshape(M, K)

    # weights (Cout, Cin, KH, KW) -> (ky, kx, cin, Cout) -> (K, Cout)
    w = jnp.transpose(w_oihw, (2, 3, 1, 0)).reshape(K, Cout).astype(mxu_dtype)

    # --- M tiling: biggest tile within the chip VMEM budget, >= 4 grid steps -
    TM = min(_round_up(tile_m, SUBLANE), _round_up(M, SUBLANE))
    while TM > SUBLANE and _vmem_footprint(TM, K, Cout, itemsize) > _VMEM_BUDGET:
        TM = max(SUBLANE, (TM // 2 // SUBLANE) * SUBLANE)
    while TM > SUBLANE and (M + TM - 1) // TM < 4:       # v7x megacore balance
        TM = max(SUBLANE, (TM // 2 // SUBLANE) * SUBLANE)
    Mp = _round_up(M, TM)
    n_tiles = Mp // TM
    if Mp != M:
        patches = jnp.pad(patches, ((0, Mp - M), (0, 0)))

    # Gate (review item 1): re-doing the dot in phase 2 beats a y round trip
    # only when a patches row is no wider than a y row.
    recompute_y = K * itemsize <= Cout * 4

    cparams = pltpu.CompilerParams(
        dimension_semantics=("parallel",),
        vmem_limit_bytes=_VMEM_LIMIT)

    patch_spec = pl.BlockSpec((TM, K), lambda i: (i, 0))
    weight_spec = pl.BlockSpec((K, Cout), lambda i: (0, 0))
    y_spec = pl.BlockSpec((TM, Cout), lambda i: (i, 0))
    stat_spec = pl.BlockSpec((1, 2, Cout), lambda i: (i, 0, 0))
    affine_spec = pl.BlockSpec((1, Cout), lambda i: (0, 0))
    stats_shape = jax.ShapeDtypeStruct((n_tiles, 2, Cout), jnp.float32)

    # --- phase 1: conv matmul + per-tile partial BN statistics ---------------
    conv_bytes = itemsize * (Mp * K + K * Cout) + 4 * n_tiles * 2 * Cout
    if recompute_y:
        cost1 = pl.CostEstimate(flops=2 * Mp * K * Cout, transcendentals=0,
                                bytes_accessed=conv_bytes)
        partial = pl.pallas_call(
            _conv_stats_kernel,
            out_shape=stats_shape,
            grid=(n_tiles,),
            in_specs=[patch_spec, weight_spec],
            out_specs=stat_spec,
            compiler_params=cparams,
            cost_estimate=cost1,
        )(patches, w)
        y_full = None
    else:
        cost1 = pl.CostEstimate(flops=2 * Mp * K * Cout, transcendentals=0,
                                bytes_accessed=conv_bytes + 4 * Mp * Cout)
        y_full, partial = pl.pallas_call(
            _conv_y_stats_kernel,
            out_shape=(jax.ShapeDtypeStruct((Mp, Cout), jnp.float32), stats_shape),
            grid=(n_tiles,),
            in_specs=[patch_spec, weight_spec],
            out_specs=(y_spec, stat_spec),
            compiler_params=cparams,
            cost_estimate=cost1,
        )(patches, w)

    # --- combine partials, fold BN into per-channel affine (tiny, plain JAX) -
    sums = jnp.sum(partial[:, 0, :], axis=0)                 # (Cout,)
    sumsq = jnp.sum(partial[:, 1, :], axis=0)                # (Cout,)
    inv_m = jnp.float32(1.0 / M)                             # true M, not padded
    mean = sums * inv_m
    var = jnp.maximum(sumsq * inv_m - mean * mean, 0.0)      # biased (train) var
    inv_std = lax.rsqrt(var + BN_EPS)
    g32 = gamma.astype(jnp.float32)
    b32 = beta.astype(jnp.float32)
    scale = (g32 * inv_std).reshape(1, Cout)
    shift = (b32 - mean * g32 * inv_std).reshape(1, Cout)

    # --- phase 2: normalize + LeakyReLU ---------------------------------------
    out_shape = jax.ShapeDtypeStruct((Mp, Cout), jnp.float32)
    if recompute_y:
        cost2 = pl.CostEstimate(
            flops=2 * Mp * K * Cout + 3 * Mp * Cout, transcendentals=0,
            bytes_accessed=itemsize * (Mp * K + K * Cout) + 4 * (Mp * Cout + 4 * Cout))
        out = pl.pallas_call(
            _conv_affine_lrelu_kernel,
            out_shape=out_shape,
            grid=(n_tiles,),
            in_specs=[patch_spec, weight_spec, affine_spec, affine_spec],
            out_specs=y_spec,
            compiler_params=cparams,
            cost_estimate=cost2,
        )(patches, w, scale, shift)
    else:
        cost2 = pl.CostEstimate(
            flops=3 * Mp * Cout, transcendentals=0,
            bytes_accessed=4 * (2 * Mp * Cout + 4 * Cout))
        out = pl.pallas_call(
            _affine_lrelu_kernel,
            out_shape=out_shape,
            grid=(n_tiles,),
            in_specs=[y_spec, affine_spec, affine_spec],
            out_specs=y_spec,
            input_output_aliases={0: 0},       # overwrite y in place
            compiler_params=cparams,
            cost_estimate=cost2,
        )(y_full, scale, shift)

    # --- glue: drop M padding (if any), back to NCHW --------------------------
    if Mp != M:
        out = out[:M]
    out = out.reshape(N, Ho, Wo, Cout)
    # TODO(synk): consumers accepting NHWC can skip this transpose (one HBM pass).
    return jnp.transpose(out, (0, 3, 1, 2))


def reference_forward(x_nchw, w_oihw, gamma, beta):
    """Pure-JAX reference (conv + train-mode BN + LeakyReLU)."""
    y = lax.conv_general_dilated(
        x_nchw.astype(jnp.float32), w_oihw.astype(jnp.float32),
        window_strides=(2, 2), padding=((1, 1), (1, 1)),
        dimension_numbers=("NCHW", "OIHW", "NCHW"))
    mean = jnp.mean(y, axis=(0, 2, 3), keepdims=True)
    var = jnp.mean((y - mean) ** 2, axis=(0, 2, 3), keepdims=True)
    z = (y - mean) * lax.rsqrt(var + BN_EPS)
    z = z * gamma.reshape(1, -1, 1, 1) + beta.reshape(1, -1, 1, 1)
    return jnp.where(z >= 0, z, NEG_SLOPE * z)


if __name__ == "__main__":
    key = jax.random.PRNGKey(0)
    k_x, k_w = jax.random.split(key)

    N, Cin, H, W = 2, 4, 16, 16
    Cout = 8

    x = jax.random.normal(k_x, (N, Cin, H, W), dtype=jnp.float32)

    # Conv2d kaiming-like init; BN defaults gamma=1, beta=0 (train mode, fresh module).
    fan_in = Cin * 3 * 3
    w = jax.random.normal(k_w, (Cout, Cin, 3, 3), dtype=jnp.float32) * (2.0 / fan_in) ** 0.5
    gamma = jnp.ones((Cout,), dtype=jnp.float32)
    beta = jnp.zeros((Cout,), dtype=jnp.float32)

    out = downsample_forward(x, w, gamma, beta)
    out = jax.block_until_ready(out)

    ref = jax.block_until_ready(reference_forward(x, w, gamma, beta))
    assert out.shape == (N, Cout, H // 2, W // 2), out.shape
    assert jnp.allclose(out, ref, rtol=1e-3, atol=1e-3), float(jnp.max(jnp.abs(out - ref)))

    print("KERNEL_OK")
</pallas_src>

<mosaic_0001>
module attributes {stable_mosaic.version = 11 : i64} {
  func.func @_conv_y_stats_kernel(%arg0: i32, %arg1: memref<32x36xf32, #tpu.memory_space<vmem>>, %arg2: memref<36x8xf32, #tpu.memory_space<vmem>>, %arg3: memref<32x8xf32, #tpu.memory_space<vmem>>, %arg4: memref<1x2x8xf32, #tpu.memory_space<vmem>>) attributes {dimension_semantics = [#tpu.dimension_semantics<parallel>], iteration_bounds = array<i64: 4>, scalar_prefetch = 0 : i64, scratch_operands = 0 : i64, tpu.core_type = #tpu.core_type<tc>, window_params = [{transform_indices = @transform_0, window_bounds = array<i64: 32, 36>}, {pipeline_mode = #tpu.pipeline_mode<synchronous>, transform_indices = @transform_1, window_bounds = array<i64: 36, 8>}, {transform_indices = @transform_2, window_bounds = array<i64: 32, 8>}, {transform_indices = @transform_3, window_bounds = array<i64: 1, 2, 8>}]} {
    %c0 = arith.constant 0 : index
    %c0_0 = arith.constant 0 : index
    %0 = vector.load %arg1[%c0, %c0_0] : memref<32x36xf32, #tpu.memory_space<vmem>>, vector<32x36xf32>
    %c0_1 = arith.constant 0 : index
    %c0_2 = arith.constant 0 : index
    %1 = vector.load %arg2[%c0_1, %c0_2] : memref<36x8xf32, #tpu.memory_space<vmem>>, vector<36x8xf32>
    %cst = arith.constant dense<0.000000e+00> : vector<32x8xf32>
    %2 = tpu.matmul %0, %1, %cst {dimension_numbers = #tpu.dot_dimension_numbers<[1], [0], [0], [1], [0, 0, 1, 1], [], []>} : vector<32x36xf32>, vector<36x8xf32>, vector<32x8xf32> -> vector<32x8xf32>
    %c0_3 = arith.constant 0 : index
    %c0_4 = arith.constant 0 : index
    %3 = vector.load %arg3[%c0_3, %c0_4] : memref<32x8xf32, #tpu.memory_space<vmem>>, vector<32x8xf32>
    tpu.vector_store %arg3[%c0_3, %c0_4], %2 {strides = array<i32>} : memref<32x8xf32, #tpu.memory_space<vmem>>, vector<32x8xf32>,
    %cst_5 = arith.constant dense<0.000000e+00> : vector<8xf32>
    %4 = vector.multi_reduction <add>, %2, %cst_5 [0] : vector<32x8xf32> to vector<8xf32>
    %5 = vector.shape_cast %4 : vector<8xf32> to vector<1x8xf32>
    %6 = arith.mulf %2, %2 : vector<32x8xf32>
    %cst_6 = arith.constant dense<0.000000e+00> : vector<8xf32>
    %7 = vector.multi_reduction <add>, %6, %cst_6 [0] : vector<32x8xf32> to vector<8xf32>
    %8 = vector.shape_cast %7 : vector<8xf32> to vector<1x8xf32>
    %9 = tpu.concatenate %5, %8 in 0 : vector<1x8xf32>, vector<1x8xf32> -> vector<2x8xf32>
    %10 = vector.shape_cast %9 : vector<2x8xf32> to vector<1x2x8xf32>
    %c0_7 = arith.constant 0 : index
    %c0_8 = arith.constant 0 : index
    %c0_9 = arith.constant 0 : index
    %11 = vector.load %arg4[%c0_7, %c0_8, %c0_9] : memref<1x2x8xf32, #tpu.memory_space<vmem>>, vector<1x2x8xf32>
    tpu.vector_store %arg4[%c0_7, %c0_8, %c0_9], %10 {strides = array<i32>} : memref<1x2x8xf32, #tpu.memory_space<vmem>>, vector<1x2x8xf32>,
    return
  }
  func.func @transform_0(%arg0: i32) -> (i32, i32) {
    %c0_i32 = arith.constant 0 : i32
    %c0_i32_0 = arith.constant 0 : i32
    return %arg0, %c0_i32 : i32, i32
  }
  func.func @transform_1(%arg0: i32) -> (i32, i32) {
    %c0_i32 = arith.constant 0 : i32
    %c0_i32_0 = arith.constant 0 : i32
    %c0_i32_1 = arith.constant 0 : i32
    return %c0_i32, %c0_i32_0 : i32, i32
  }
  func.func @transform_2(%arg0: i32) -> (i32, i32) {
    %c0_i32 = arith.constant 0 : i32
    %c0_i32_0 = arith.constant 0 : i32
    return %arg0, %c0_i32 : i32, i32
  }
  func.func @transform_3(%arg0: i32) -> (i32, i32, i32) {
    %c0_i32 = arith.constant 0 : i32
    %c0_i32_0 = arith.constant 0 : i32
    %c0_i32_1 = arith.constant 0 : i32
    return %arg0, %c0_i32, %c0_i32_0 : i32, i32, i32
  }
}

module attributes {stable_mosaic.version = 11 : i64} {
  func.func @_affine_lrelu_kernel(%arg0: i32, %arg1: memref<32x8xf32, #tpu.memory_space<vmem>>, %arg2: memref<1x8xf32, #tpu.memory_space<vmem>>, %arg3: memref<1x8xf32, #tpu.memory_space<vmem>>, %arg4: memref<32x8xf32, #tpu.memory_space<vmem>>) attributes {dimension_semantics = [#tpu.dimension_semantics<parallel>], iteration_bounds = array<i64: 4>, scalar_prefetch = 0 : i64, scratch_operands = 0 : i64, tpu.core_type = #tpu.core_type<tc>, window_params = [{transform_indices = @transform_0, window_bounds = array<i64: 32, 8>}, {pipeline_mode = #tpu.pipeline_mode<synchronous>, transform_indices = @transform_1, window_bounds = array<i64: 1, 8>}, {pipeline_mode = #tpu.pipeline_mode<synchronous>, transform_indices = @transform_2, window_bounds = array<i64: 1, 8>}, {transform_indices = @transform_3, window_bounds = array<i64: 32, 8>}]} {
    %c0 = arith.constant 0 : index
    %c0_0 = arith.constant 0 : index
    %0 = vector.load %arg1[%c0, %c0_0] : memref<32x8xf32, #tpu.memory_space<vmem>>, vector<32x8xf32>
    %c0_1 = arith.constant 0 : index
    %c0_2 = arith.constant 0 : index
    %1 = vector.load %arg2[%c0_1, %c0_2] : memref<1x8xf32, #tpu.memory_space<vmem>>, vector<1x8xf32>
    %2 = vector.broadcast %1 : vector<1x8xf32> to vector<32x8xf32>
    %3 = arith.mulf %0, %2 : vector<32x8xf32>
    %c0_3 = arith.constant 0 : index
    %c0_4 = arith.constant 0 : index
    %4 = vector.load %arg3[%c0_3, %c0_4] : memref<1x8xf32, #tpu.memory_space<vmem>>, vector<1x8xf32>
    %5 = vector.broadcast %4 : vector<1x8xf32> to vector<32x8xf32>
    %6 = arith.addf %3, %5 : vector<32x8xf32>
    %cst = arith.constant 0.000000e+00 : f32
    %7 = vector.broadcast %cst : f32 to vector<32x8xf32>
    %8 = arith.cmpf oge, %6, %7 : vector<32x8xf32>
    %cst_5 = arith.constant 1.000000e-01 : f32
    %9 = vector.broadcast %cst_5 : f32 to vector<32x8xf32>
    %10 = arith.mulf %9, %6 : vector<32x8xf32>
    %11 = arith.select %8, %6, %10 : vector<32x8xi1>, vector<32x8xf32>
    %c0_6 = arith.constant 0 : index
    %c0_7 = arith.constant 0 : index
    %12 = vector.load %arg4[%c0_6, %c0_7] : memref<32x8xf32, #tpu.memory_space<vmem>>, vector<32x8xf32>
    tpu.vector_store %arg4[%c0_6, %c0_7], %11 {strides = array<i32>} : memref<32x8xf32, #tpu.memory_space<vmem>>, vector<32x8xf32>,
    return
  }
  func.func @transform_0(%arg0: i32) -> (i32, i32) {
    %c0_i32 = arith.constant 0 : i32
    %c0_i32_0 = arith.constant 0 : i32
    return %arg0, %c0_i32 : i32, i32
  }
  func.func @transform_1(%arg0: i32) -> (i32, i32) {
    %c0_i32 = arith.constant 0 : i32
    %c0_i32_0 = arith.constant 0 : i32
    %c0_i32_1 = arith.constant 0 : i32
    return %c0_i32, %c0_i32_0 : i32, i32
  }
  func.func @transform_2(%arg0: i32) -> (i32, i32) {
    %c0_i32 = arith.constant 0 : i32
    %c0_i32_0 = arith.constant 0 : i32
    %c0_i32_1 = arith.constant 0 : i32
    return %c0_i32, %c0_i32_0 : i32, i32
  }
  func.func @transform_3(%arg0: i32) -> (i32, i32) {
    %c0_i32 = arith.constant 0 : i32
    %c0_i32_0 = arith.constant 0 : i32
    return %arg0, %c0_i32 : i32, i32
  }
}

</mosaic_0001>

<bundles_post_ra>
// kernel: downsample_forward.3
= control target key start
LH: loop header
LB: loop body
LE: loop exit
PB: predicated region body
PF: predicated region fallthrough
CT: control target
= control target key end

     0   :  { %s322_s12 = smov 0   ;;  %s349_s0 = inlined_call_operand.vmem [shape: f32[128,8], index: 0, kind: input, shape index: {}, may-alias: {0,3}]   ;;  %s350_s1 = inlined_call_operand.vmem [shape: f32[1,8], index: 1, kind: input, shape index: {}]   ;;  %s351_s2 = inlined_call_operand.vmem [shape: f32[1,8], index: 2, kind: input, shape index: {}]   ;;  %s352_s3 = inlined_call_operand.vmem [shape: f32[128,8], index: 3, kind: output, shape index: {}, may-alias: {0,3}]  }
   0x1 LB: > { %s273_s13 = sadd.s32 4294967295, %s300_s12   ;;  %p277_p0 = scmp.ge.s32.totalorder %s300_s12, 1  ;;  %s300_s12 = sphi %s322_s12, %s13_s12  }
   0x2   : > { %p138_p1 = scmp.lt.s32.totalorder %s300_s12, 5 }
   0x4   : > { %p139_p2 = pnand %p277_p0, %p138_p1 }
   0x5   : > { %s278_s14 = sshll.u32 (!%p139_p2), %s273_s13, 2  ;;  %v282_v0 = vld [vmem:[%s350_s1] ss:$0 sm:$0xff] (!%p139_p2)  ;;  %vm212_vm0 = vcmask (!%p139_p2), 64512  }
   0x6   : > { %142 = sbr.rel (%p139_p2) target bundleno = 26 (0x1a), region = 32  ;;  %p163_p3 = scmp.lt.s32.totalorder (!%p139_p2), %s278_s14, 15  ;;  %v283_v1 = vld [vmem:[%s351_s2] ss:$0 sm:$0xff] (!%p139_p2) }
   0xd   : > { %s354_s14 = smov (!%p163_p3, %s278_s14), 15 }
   0xe   : > { %s279_s15 = sshll.u32 %s354_s14, 3 }
   0xf   : > { %s166_s20 = scalar_lea.vmem %s349_s0, %s279_s15  ;;  %s172_s25 = scalar_lea.vmem %s352_s3, %s279_s15 }
  0x10   : > { %v174_v2 = vld [vmem:[%s166_s20] sm:$0xff]  ;;  %v175_v3 = vld [vmem:[%s166_s20 + $0x8] sm:$0xff]  ;;  %v176_v4 = vld [vmem:[%s166_s20 + $0x10] sm:$0xff] }
  0x11   : > { %v177_v5 = vld [vmem:[%s166_s20 + $0x18] sm:$0xff]  ;;  %v185_v6 = vmul.f32 %v282_v0, %v174_v2  ;;  %v186_v7 = vmul.f32 %v282_v0, %v175_v3  ;;  %v187_v8 = vmul.f32 %v282_v0, %v176_v4 }
  0x12   : > { %v188_v9 = vmul.f32 %v282_v0, %v177_v5 }
  0x13   : > { %v196_v10 = vadd.f32 %v283_v1, %v185_v6  ;;  %v197_v11 = vadd.f32 %v283_v1, %v186_v7  ;;  %v198_v12 = vadd.f32 %v283_v1, %v187_v8 }
  0x14   : > { %v199_v13 = vadd.f32 %v283_v1, %v188_v9 }
  0x15   : > { %vm200_vm1 = vcmp.ge.f32.partialorder %v196_v10, 0.0  ;;  %v204_v14 = vmul.f32 0.1, %v196_v10  ;;  %vm201_vm2 = vcmp.ge.f32.partialorder %v197_v11, 0.0  ;;  %v205_v15 = vmul.f32 0.1, %v197_v11 }
  0x16   : > { %vm202_vm3 = vcmp.ge.f32.partialorder %v198_v12, 0.0  ;;  %v206_v16 = vmul.f32 0.1, %v198_v12  ;;  %vm203_vm4 = vcmp.ge.f32.partialorder %v199_v13, 0.0  ;;  %v207_v17 = vmul.f32 0.1, %v199_v13 }
  0x17   : > { %v208_v18 = vsel %vm200_vm1, %v196_v10, %v204_v14  ;;  %v209_v19 = vsel %vm201_vm2, %v197_v11, %v205_v15 }
  0x18   : > { %213 = vst.msk [vmem:[%s172_s25] sm:$0xff] %vm212_vm0, %v208_v18  ;;  %214 = vst.msk [vmem:[%s172_s25 + $0x8] sm:$0xff] %vm212_vm0, %v209_v19  ;;  %v210_v20 = vsel %vm202_vm3, %v198_v12, %v206_v16  ;;  %v211_v21 = vsel %vm203_vm4, %v199_v13, %v207_v17 }
  0x19   : > { %215 = vst.msk [vmem:[%s172_s25 + $0x10] sm:$0xff] %vm212_vm0, %v210_v20  ;;  %216 = vst.msk [vmem:[%s172_s25 + $0x18] sm:$0xff] %vm212_vm0, %v211_v21 }
  0x1a PF: > { %s13_s12 = sadd.s32 1, %s300_s12  }
  0x1b   : > { %p10_p4 = scmp.ge.s32.totalorder %s13_s12, 6  }
  0x1d   :  { %12 = sbr.rel (!%p10_p4) target bundleno = 1 (0x1), region = 62 }

// kernel: downsample_forward.2
= control target key start
LH: loop header
LB: loop body
LE: loop exit
PB: predicated region body
PF: predicated region fallthrough
CT: control target
= control target key end

     0   :  { %s514_s12 = smov 0   ;;  %s566_s0 = inlined_call_operand.vmem [shape: f32[128,36], index: 0, kind: input, shape index: {}]   ;;  %s567_s1 = inlined_call_operand.vmem [shape: f32[36,8], index: 1, kind: input, shape index: {}]   ;;  %s568_s2 = inlined_call_operand.vmem [shape: f32[128,8], index: 2, kind: output, shape index: {0}]   ;;  %s569_s3 = inlined_call_operand.vmem [shape: f32[4,2,8], index: 3, kind: output, shape index: {1}]  }
   0x1 LB: > { %s520_s13 = sadd.s32 4294967295, %s492_s12   ;;  %p426_p0 = scmp.ge.s32.totalorder %s492_s12, 1  ;;  %s492_s12 = sphi %s514_s12, %s14_s12  }
   0x2   : > { %p141_p1 = scmp.lt.s32.totalorder %s492_s12, 5 }
   0x4   : > { %p142_p2 = pnand %p426_p0, %p141_p1 }
   0x5   : > { %v189_v0 = vld [vmem:[%s567_s1] sm:$0xff] (!%p142_p2)  ;;  %v190_v1 = vld [vmem:[%s567_s1 + $0x8] sm:$0xff] (!%p142_p2)  ;;  %v191_v2 = vld [vmem:[%s567_s1 + $0x10] sm:$0xff] (!%p142_p2)  ;;  %s427_s20 = sshll.u32 (!%p142_p2), %s520_s13, 2  ;;  %vm207_vm0 = vcmask (!%p142_p2), 1043456   ;;  %vm194_vm1 = vcmask (!%p142_p2), 293888  }
   0x6   : > { %145 = sbr.rel (%p142_p2) target bundleno = 255 (0xff), region = 28  ;;  %v464_v3 = vpack.c.bf16 (!%p142_p2), %v190_v1, %v189_v0  ;;  %v192_v4 = vld [vmem:[%s567_s1 + $0x18] sm:$0xff] (!%p142_p2)  ;;  %p170_p3 = scmp.lt.s32.totalorder (!%p142_p2), %s427_s20, 15  ;;  %v193_v6 = vld [vmem:[%s567_s1 + $0x20] sm:$0xf] (!%p142_p2)  ;;  %vm296_vm2 = vcmask (!%p142_p2), 64512  }
   0x7   : > { %v468_v5 = vpack.c.bf16 (!%p142_p2), %v192_v4, %v191_v2  ;;  %p181_p4 = scmp.lt.s32.totalorder (!%p142_p2), %s520_s13, 3  ;;  %vm331_vm3 = vcmask (!%p142_p2), 1040384   ;;  %vm333_vm4 = vcmask (!%p142_p2), 58368  }
   0x8   : > { %465 = vmatprep.subr.bf16.mxu0 (!%p142_p2), %v464_v3  ;;  %472 = vmatprep.subr.bf16.mxu1 (!%p142_p2), %v464_v3 }
   0x9   : > { %467 = vmatpush3.bf16.msra.mxu0 (!%p142_p2), %v464_v3  ;;  %475 = vmatpush3.bf16.msra.mxu1 (!%p142_p2), %v464_v3 }
   0xa   : > { %469 = vmatprep.subr.bf16.mxu0 (!%p142_p2), %v468_v5  ;;  %473 = vmatprep.subr.bf16.mxu1 (!%p142_p2), %v468_v5 }
   0xd   : > { %s571_s20 = smov (!%p170_p3, %s427_s20), 15  ;;  %471 = vmatpush3.bf16.msra.mxu0 %v468_v5  ;;  %476 = vmatpush3.bf16.msra.mxu1 %v468_v5  ;;  %s573_s13 = smov (!%p181_p4, %s520_s13), 3 }
   0xe   : > { %s428_s23 = sshll.u32 %s571_s20, 3  ;;  %456 = vmatprep.subr.msk.mxu0 %vm207_vm0, %v193_v6  ;;  %474 = vmatprep.subr.msk.mxu1 %vm207_vm0, %v193_v6  ;;  %s431_s5 = sshll.u32 %s573_s13, 1 }
   0xf   : > { %s173_s28 = scalar_lea.vmem %s566_s0, %s428_s23  ;;  %s179_s4 = scalar_lea.vmem %s568_s2, %s428_s23 }
  0x10   : > { %v185_v7 = vld [vmem:[%s173_s28] sm:$0xff]  ;;  %v187_v8 = vld [vmem:[%s173_s28 + $0x10] sm:$0xff]  ;;  %v186_v9 = vld [vmem:[%s173_s28 + $0x8] sm:$0xff]  ;;  %s184_s8 = scalar_lea.vmem %s569_s3, %s431_s5 }
  0x11   : > { %458 = vmatprep.mubr.msk.f32.mxu0 %vm194_vm1, %v185_v7  ;;  %461 = vmatprep.mubr.msk.f32.mxu1 %vm194_vm1, %v187_v8  ;;  %v188_v10 = vld [vmem:[%s173_s28 + $0x18] sm:$0xff] }
  0x12   : > { %457 = vmatpush3.msk.msra.mxu0 %vm207_vm0, %v193_v6  ;;  %477 = vmatpush3.msk.msra.mxu1 %vm207_vm0, %v193_v6 }
  0x13   : > { %459 = vmatmul.mubr.msk.f32.vlgmr.msra.gmra.mrb[0].mxu0 %vm194_vm1, %v186_v9  ;;  %462 = vmatmul.mubr.msk.f32.vlgmr.msra.gmra.mrb[0].mxu1 %vm194_vm1, %v188_v10 }
  0xe6   : > { %v460_v11 = vpop.f32.mrb[0].mxu0  ;;  %v463_v12 = vpop.f32.mrb[0].mxu1 }
  0xe7   : > { %298 = vst.msk [vmem:[%s179_s4 + $0x8] sm:$0xff] %vm296_vm2, %v460_v11  ;;  %v302_v13 = vsel %vm296_vm2, %v460_v11, 0.0  ;;  %v315_v14 = vmul.f32 %v460_v11, %v460_v11  ;;  %v277_v15 = vpop.f32.mrb[1].mxu0  ;;  %300 = vst.msk [vmem:[%s179_s4 + $0x18] sm:$0xff] %vm296_vm2, %v463_v12  ;;  %v287_v16 = vpop.f32.mrb[1].mxu1  ;;  %v317_v24 = vmul.f32 %v463_v12, %v463_v12  ;;  %v306_v28 = vsel %vm296_vm2, %v463_v12, 0.0 }
  0xe8   : > { %297 = vst.msk [vmem:[%s179_s4] sm:$0xff] %vm296_vm2, %v277_v15  ;;  %v301_v17 = vsel %vm296_vm2, %v277_v15, 0.0  ;;  %v314_v18 = vmul.f32 %v277_v15, %v277_v15  ;;  %299 = vst.msk [vmem:[%s179_s4 + $0x10] sm:$0xff] %vm296_vm2, %v287_v16  ;;  %v304_v19 = vsel %vm296_vm2, %v287_v16, 0.0  ;;  %v316_v20 = vmul.f32 %v287_v16, %v287_v16 }
  0xe9   : > { %v319_v21 = vsel %vm296_vm2, %v315_v14, 0.0  ;;  %v303_v22 = vadd.f32 %v302_v13, %v301_v17  ;;  %v323_v31 = vsel %vm296_vm2, %v317_v24, 0.0 }
  0xea   : > { %v318_v23 = vsel %vm296_vm2, %v314_v18, 0.0  ;;  %v321_v25 = vsel %vm296_vm2, %v316_v20, 0.0 }
  0xeb   : > { %v320_v26 = vadd.f32 %v319_v21, %v318_v23  ;;  %v305_v27 = vadd.f32 %v304_v19, %v303_v22 }
  0xed   : > { %v307_v29 = vadd.f32 %v306_v28, %v305_v27  ;;  %v322_v30 = vadd.f32 %v321_v25, %v320_v26 }
  0xef   : > { %v308_v32 = vrot.slane %v307_v29, 4  ;;  %v324_v33 = vadd.f32 %v323_v31, %v322_v30 }
  0xf1   : > { %v309_v34 = vadd.f32 %v308_v32, %v307_v29  ;;  %v325_v35 = vrot.slane %v324_v33, 4 }
  0xf3   : > { %v310_v36 = vrot.slane %v309_v34, 2  ;;  %v326_v37 = vadd.f32 %v325_v35, %v324_v33 }
  0xf5   : > { %v311_v38 = vadd.f32 %v310_v36, %v309_v34  ;;  %v327_v39 = vrot.slane %v326_v37, 2 }
  0xf7   : > { %v312_v40 = vrot.slane %v311_v38, 1  ;;  %v328_v41 = vadd.f32 %v327_v39, %v326_v37 }
  0xf9   : > { %v329_v42 = vrot.slane %v328_v41, 1  ;;  %v313_v43 = vadd.f32 %v312_v40, %v311_v38 }
  0xfb   : > { %v330_v44 = vadd.f32 %v329_v42, %v328_v41 }
  0xfd   : > { %v332_v45 = vsel %vm331_vm3, %v313_v43, %v330_v44 }
  0xfe   : > { %334 = vst.msk [vmem:[%s184_s8] sm:$0x3] %vm333_vm4, %v332_v45 }
  0xff PF: > { %s14_s12 = sadd.s32 1, %s492_s12  }
 0x100   : > { %p11_p5 = scmp.ge.s32.totalorder %s14_s12, 6  }
 0x102   :  { %13 = sbr.rel (!%p11_p5) target bundleno = 1 (0x1), region = 70 }

</bundles_post_ra>
